<compile_context>
chip_gen: v5e
topology: v5e:2x2
jax: 0.10.0
libtpu: 0.0.40
codegen_flags: <defaults>
</compile_context>

<pallas_src>
import functools
import math

import jax
import jax.numpy as jnp
from jax.experimental import pallas as pl
from jax.experimental.pallas import tpu as pltpu

_MIB = 1024 * 1024


def _vmem_capacity_bytes():
    """Physical VMEM of the current generation (conservative 64 MiB fallback)."""
    try:
        info = pltpu.get_tpu_info()
        cap = getattr(info, "vmem_capacity_bytes", None)
        if cap:
            return int(cap)
    except Exception:
        pass
    return 64 * _MIB


def _poincare_scale_from_ssq(ssq, *, c, clip_r):
    """Per-row multiplicative factor taking raw x to the projected ball point.

    `ssq` holds sum(x*x) over the feature dim (any broadcastable shape).  All of
    clip / expmap0 / project reduce to a single scalar factor per row:
        out = x * fac * tanh(a)/a * min(1, maxnorm/||gamma_1||)
    Heavy per-element ops: 1 sqrt, 1 tanh, 2 exact divides (1 if clip_r is None).
    """
    sqrt_c = math.sqrt(c)
    inv_sqrt_c = 1.0 / sqrt_c
    maxnorm = (1.0 - 1e-3) / sqrt_c

    raw_norm = jnp.sqrt(ssq)

    if clip_r is not None:
        fac = jnp.minimum(1.0, clip_r / (raw_norm + 1e-5))
        clipped_norm = raw_norm * fac
    else:
        fac = None
        clipped_norm = raw_norm

    # expmap0 scale: tanh(sqrt_c*u)/(sqrt_c*u) with u = max(||x_clipped||, 1e-5)
    u = jnp.maximum(clipped_norm, 1e-5)
    inv_u = 1.0 / u                                   # reused by the projection
    scale = jnp.tanh(sqrt_c * u) * (inv_sqrt_c * inv_u)   # tanh -> EUP

    # project: ||gamma_1|| = scale * ||x_clipped|| (scalar algebra, no reduce);
    # when the projection fires, scale*maxnorm/||gamma_1|| == maxnorm/||x_clipped||.
    g_norm = scale * clipped_norm
    scale = jnp.where(g_norm > maxnorm, maxnorm * inv_u, scale)

    if fac is not None:
        scale = scale * fac
    return scale


def _to_poincare_rows_kernel(x_ref, o_ref, *, c, clip_r):
    """Plain layout: rows on sublanes, feature dim on lanes. One XLU reduce."""
    x = x_ref[...].astype(jnp.float32)                      # (R, D)
    ssq = jnp.sum(x * x, axis=-1, keepdims=True)            # the only reduction
    o_ref[...] = (x * _poincare_scale_from_ssq(ssq, c=c, clip_r=clip_r)).astype(o_ref.dtype)


def _to_poincare_packed_kernel(x_ref, seg_ref, o_ref, *, c, clip_r):
    """Lane-dense layout: several rows packed per lane-row (width = lcm(D,128)).

    seg[i, j] = 1 iff lanes i and j belong to the same packed row; (x*x) @ seg
    leaves each row's sum of squares replicated across its own lanes, so no XLU
    cross-lane reduce and no broadcast-back are needed (MXU is otherwise idle).
    The f32 (x*x) is split into three bf16 terms -> 3 DEFAULT-precision bf16
    matmuls (seg is bf16-exact), ~f32 accuracy at half the MXU passes of
    Precision.HIGHEST.
    """
    x = x_ref[...].astype(jnp.float32)                      # (R, W), W % 128 == 0
    xsq = x * x
    p0 = xsq.astype(jnp.bfloat16)
    r1 = xsq - p0.astype(jnp.float32)
    p1 = r1.astype(jnp.bfloat16)
    p2 = (r1 - p1.astype(jnp.float32)).astype(jnp.bfloat16)
    seg = seg_ref[...]                                      # (W, W) bf16 0/1, resident
    ssq = (jnp.dot(p0, seg, preferred_element_type=jnp.float32)
           + jnp.dot(p1, seg, preferred_element_type=jnp.float32)
           + jnp.dot(p2, seg, preferred_element_type=jnp.float32))
    o_ref[...] = (x * _poincare_scale_from_ssq(ssq, c=c, clip_r=clip_r)).astype(o_ref.dtype)


def _packed_width(dim):
    """Lane-dense packed width = lcm(dim, 128), if small enough to be worthwhile."""
    if dim <= 0 or dim >= 128:
        return None
    width = (dim * 128) // math.gcd(dim, 128)
    return width if width <= 512 else None


def _make_seg(width, dim):
    """(width, width) 0/1 segment-indicator matrix, bf16-exact."""
    idx = jnp.arange(width, dtype=jnp.int32) // dim
    return (idx[:, None] == idx[None, :]).astype(jnp.bfloat16)


def _pick_block_rows(num_rows, width, itemsize):
    """Sublane-granular row-block sized for this generation's VMEM.

    No divisibility requirement (the grid uses cdiv and Pallas masks the ragged
    last block).  If the whole batch would fit in one block but there is enough
    work, halve it so the grid has >= 2 steps (megacore split + pipelining).
    """
    mult = 8 * max(1, 4 // max(1, itemsize))                # 8 for f32, 16 for bf16
    if num_rows <= mult:
        return num_rows                                     # full-dim block (allowed)
    cap = _vmem_capacity_bytes()
    target = 8 * _MIB if cap >= 96 * _MIB else 4 * _MIB     # f32-equivalent per block
    block = min(num_rows, max(mult, target // (width * 4)))
    block = max(mult, (block // mult) * mult)
    if block >= num_rows:
        half = -(-num_rows // 2)
        block = max(mult, ((half + mult - 1) // mult) * mult)
    return block


def _launch(kernel, x2d, block_rows, extra_inputs=()):
    rows, width = x2d.shape
    itemsize = jnp.dtype(x2d.dtype).itemsize
    if block_rows is None:
        block_rows = _pick_block_rows(rows, width, itemsize)
    block_rows = min(block_rows, rows)
    grid = (pl.cdiv(rows, block_rows),)

    # 2x double-buffered in/out blocks plus in-kernel f32 temporaries, capped
    # with headroom below the physical VMEM of the current generation.
    block_f32_bytes = block_rows * width * 4
    cap = _vmem_capacity_bytes()
    vmem_limit = int(min(cap - 16 * _MIB, max(32 * _MIB, 12 * block_f32_bytes)))

    in_specs = [pl.BlockSpec((block_rows, width), lambda i: (i, 0))]
    for e in extra_inputs:
        # Constant block index -> stays resident across the grid (no re-DMA).
        in_specs.append(pl.BlockSpec(e.shape, lambda i: (0, 0)))

    return pl.pallas_call(
        kernel,
        out_shape=jax.ShapeDtypeStruct((rows, width), x2d.dtype),
        grid_spec=pl.GridSpec(
            grid=grid,
            in_specs=in_specs,
            out_specs=pl.BlockSpec((block_rows, width), lambda i: (i, 0)),
        ),
        compiler_params=pltpu.CompilerParams(
            dimension_semantics=("parallel",),
            vmem_limit_bytes=vmem_limit,
        ),
    )(x2d, *extra_inputs)


def to_poincare(x, *, c=1.0, clip_r=None, block_rows=None):
    """Maps Euclidean points x (..., ball_dim) onto the Poincare ball.

    block_rows (optional) refers to rows of the internal 2-D layout (after
    lane-dense packing of small feature dims); any multiple of the sublane
    granularity works — no divisibility requirement.
    """
    orig_shape = x.shape
    D = orig_shape[-1]
    B = 1
    for s in orig_shape[:-1]:
        B *= s
    x2 = x.reshape(B, D)

    # Lane-dense packing for small feature dims (free row-major reshape).
    W = _packed_width(D)
    if W is not None:
        g = W // D
        if B % g == 0 and B // g > 0:
            packed_rows = B // g
            seg = _make_seg(W, D)
            kernel = functools.partial(_to_poincare_packed_kernel, c=c, clip_r=clip_r)
            out = _launch(kernel, x2.reshape(packed_rows, W), block_rows,
                          extra_inputs=(seg,))
            return out.reshape(orig_shape)

    kernel = functools.partial(_to_poincare_rows_kernel, c=c, clip_r=clip_r)
    out = _launch(kernel, x2, block_rows)
    return out.reshape(orig_shape)


def _to_poincare_ref(x, *, c=1.0, clip_r=None):
    """Pure-JAX reference mirroring the PyTorch module (three explicit norms)."""
    x = x.astype(jnp.float32)
    if clip_r is not None:
        x_norm = jnp.linalg.norm(x, axis=-1, keepdims=True) + 1e-5
        fac = jnp.minimum(jnp.ones_like(x_norm), clip_r / x_norm)
        x = x * fac
    sqrt_c = math.sqrt(c)
    u_norm = jnp.maximum(jnp.linalg.norm(x, axis=-1, keepdims=True), 1e-5)
    gamma_1 = jnp.tanh(sqrt_c * u_norm) * x / (sqrt_c * u_norm)
    norm = jnp.maximum(jnp.linalg.norm(gamma_1, axis=-1, keepdims=True), 1e-5)
    maxnorm = (1.0 - 1e-3) / sqrt_c
    projected = gamma_1 / norm * maxnorm
    return jnp.where(norm > maxnorm, projected, gamma_1)


# TODO(synk): train_x=True branch (expmap around a learned base point xp) and the
# RiemannianGradient backward rescaling are not implemented (default config is
# train_x=False; grad_fix is identity in the forward pass).

if __name__ == "__main__":
    key = jax.random.PRNGKey(0)
    k1, k2, k3, k4 = jax.random.split(key, 4)
    c, clip_r = 1.0, 1.0

    # 1) Small shape consistent with the module: 64 points in a 32-dim ball
    #    (packed lane-dense path: (64,32) -> (16,128), grid split into 2 blocks).
    x = jax.random.normal(k1, (64, 32), dtype=jnp.float32) * 3.0
    out = jax.block_until_ready(to_poincare(x, c=c, clip_r=clip_r))
    ref = _to_poincare_ref(x, c=c, clip_r=clip_r)
    assert out.shape == x.shape
    assert jnp.allclose(out, ref, atol=1e-5, rtol=1e-5), "packed path mismatch"

    # 2) D=96 now packs lane-dense too (lcm(96,128)=384, g=4 -> (10,384)),
    #    exercising the generalized packing, a ragged last block and c != 1.
    y = jax.random.normal(k2, (40, 96), dtype=jnp.float32) * 2.0
    out_y = jax.block_until_ready(to_poincare(y, c=0.5, clip_r=None))
    ref_y = _to_poincare_ref(y, c=0.5, clip_r=None)
    assert jnp.allclose(out_y, ref_y, atol=1e-5, rtol=1e-5), "generalized packed path mismatch"

    # 3) Multi-block grid (explicit block_rows on the packed layout) to exercise
    #    the software pipeline: (256,32) packs to (64,128), grid=(4,).
    z = jax.random.normal(k3, (256, 32), dtype=jnp.float32) * 4.0
    out_z = jax.block_until_ready(to_poincare(z, c=c, clip_r=2.0, block_rows=16))
    ref_z = _to_poincare_ref(z, c=c, clip_r=2.0)
    assert jnp.allclose(out_z, ref_z, atol=1e-5, rtol=1e-5), "tiled path mismatch"

    # 4) Non-packable feature dim -> rows kernel with a ragged (cdiv) grid.
    w = jax.random.normal(k4, (40, 200), dtype=jnp.float32) * 2.0
    out_w = jax.block_until_ready(to_poincare(w, c=2.0, clip_r=1.5))
    ref_w = _to_poincare_ref(w, c=2.0, clip_r=1.5)
    assert jnp.allclose(out_w, ref_w, atol=1e-5, rtol=1e-5), "rows path mismatch"

    # 5) bf16 I/O (halves HBM traffic); math stays f32 inside the kernel.
    xb = x.astype(jnp.bfloat16)
    out_b = jax.block_until_ready(to_poincare(xb, c=c, clip_r=clip_r))
    ref_b = _to_poincare_ref(xb.astype(jnp.float32), c=c, clip_r=clip_r)
    assert out_b.dtype == jnp.bfloat16
    assert jnp.allclose(out_b.astype(jnp.float32), ref_b, atol=3e-2, rtol=3e-2), "bf16 mismatch"

    print("KERNEL_OK")
</pallas_src>

<mosaic_0001>
module attributes {stable_mosaic.version = 11 : i64} {
  func.func @_to_poincare_packed_kernel(%arg0: i32, %arg1: memref<8x128xf32, #tpu.memory_space<vmem>>, %arg2: memref<128x128xbf16, #tpu.memory_space<vmem>>, %arg3: memref<8x128xf32, #tpu.memory_space<vmem>>) attributes {dimension_semantics = [#tpu.dimension_semantics<parallel>], iteration_bounds = array<i64: 2>, scalar_prefetch = 0 : i64, scratch_operands = 0 : i64, tpu.core_type = #tpu.core_type<tc>, window_params = [{transform_indices = @transform_0, window_bounds = array<i64: 8, 128>}, {pipeline_mode = #tpu.pipeline_mode<synchronous>, transform_indices = @transform_1, window_bounds = array<i64: 128, 128>}, {transform_indices = @transform_2, window_bounds = array<i64: 8, 128>}]} {
    %c0 = arith.constant 0 : index
    %c0_0 = arith.constant 0 : index
    %0 = vector.load %arg1[%c0, %c0_0] : memref<8x128xf32, #tpu.memory_space<vmem>>, vector<8x128xf32>
    %1 = arith.mulf %0, %0 : vector<8x128xf32>
    %2 = arith.truncf %1 : vector<8x128xf32> to vector<8x128xbf16>
    %3 = arith.extf %2 : vector<8x128xbf16> to vector<8x128xf32>
    %4 = arith.subf %1, %3 : vector<8x128xf32>
    %5 = arith.truncf %4 : vector<8x128xf32> to vector<8x128xbf16>
    %6 = arith.extf %5 : vector<8x128xbf16> to vector<8x128xf32>
    %7 = arith.subf %4, %6 : vector<8x128xf32>
    %8 = arith.truncf %7 : vector<8x128xf32> to vector<8x128xbf16>
    %c0_1 = arith.constant 0 : index
    %c0_2 = arith.constant 0 : index
    %9 = vector.load %arg2[%c0_1, %c0_2] : memref<128x128xbf16, #tpu.memory_space<vmem>>, vector<128x128xbf16>
    %cst = arith.constant dense<0.000000e+00> : vector<8x128xf32>
    %10 = tpu.matmul %2, %9, %cst {dimension_numbers = #tpu.dot_dimension_numbers<[1], [0], [0], [1], [0, 0, 1, 1], [], []>} : vector<8x128xbf16>, vector<128x128xbf16>, vector<8x128xf32> -> vector<8x128xf32>
    %cst_3 = arith.constant dense<0.000000e+00> : vector<8x128xf32>
    %11 = tpu.matmul %5, %9, %cst_3 {dimension_numbers = #tpu.dot_dimension_numbers<[1], [0], [0], [1], [0, 0, 1, 1], [], []>} : vector<8x128xbf16>, vector<128x128xbf16>, vector<8x128xf32> -> vector<8x128xf32>
    %12 = arith.addf %10, %11 : vector<8x128xf32>
    %cst_4 = arith.constant dense<0.000000e+00> : vector<8x128xf32>
    %13 = tpu.matmul %8, %9, %cst_4 {dimension_numbers = #tpu.dot_dimension_numbers<[1], [0], [0], [1], [0, 0, 1, 1], [], []>} : vector<8x128xbf16>, vector<128x128xbf16>, vector<8x128xf32> -> vector<8x128xf32>
    %14 = arith.addf %12, %13 : vector<8x128xf32>
    %15 = math.sqrt %14 : vector<8x128xf32>
    %cst_5 = arith.constant 9.99999974E-6 : f32
    %16 = vector.broadcast %cst_5 : f32 to vector<8x128xf32>
    %17 = arith.addf %15, %16 : vector<8x128xf32>
    %cst_6 = arith.constant 1.000000e+00 : f32
    %18 = vector.broadcast %cst_6 : f32 to vector<8x128xf32>
    %19 = arith.divf %18, %17 : vector<8x128xf32>
    %cst_7 = arith.constant 1.000000e+00 : f32
    %20 = vector.broadcast %cst_7 : f32 to vector<8x128xf32>
    %21 = arith.minimumf %20, %19 : vector<8x128xf32>
    %22 = arith.mulf %15, %21 : vector<8x128xf32>
    %cst_8 = arith.constant 9.99999974E-6 : f32
    %23 = vector.broadcast %cst_8 : f32 to vector<8x128xf32>
    %24 = arith.maximumf %22, %23 : vector<8x128xf32>
    %cst_9 = arith.constant 1.000000e+00 : f32
    %25 = vector.broadcast %cst_9 : f32 to vector<8x128xf32>
    %26 = arith.divf %25, %24 : vector<8x128xf32>
    %cst_10 = arith.constant 1.000000e+00 : f32
    %27 = vector.broadcast %cst_10 : f32 to vector<8x128xf32>
    %28 = arith.mulf %27, %24 : vector<8x128xf32>
    %29 = math.tanh %28 : vector<8x128xf32>
    %cst_11 = arith.constant 1.000000e+00 : f32
    %30 = vector.broadcast %cst_11 : f32 to vector<8x128xf32>
    %31 = arith.mulf %30, %26 : vector<8x128xf32>
    %32 = arith.mulf %29, %31 : vector<8x128xf32>
    %33 = arith.mulf %32, %22 : vector<8x128xf32>
    %cst_12 = arith.constant 9.990000e-01 : f32
    %34 = vector.broadcast %cst_12 : f32 to vector<8x128xf32>
    %35 = arith.cmpf ogt, %33, %34 : vector<8x128xf32>
    %cst_13 = arith.constant 9.990000e-01 : f32
    %36 = vector.broadcast %cst_13 : f32 to vector<8x128xf32>
    %37 = arith.mulf %36, %26 : vector<8x128xf32>
    %38 = arith.select %35, %37, %32 : vector<8x128xi1>, vector<8x128xf32>
    %39 = arith.mulf %38, %21 : vector<8x128xf32>
    %40 = arith.mulf %0, %39 : vector<8x128xf32>
    %c0_14 = arith.constant 0 : index
    %c0_15 = arith.constant 0 : index
    %41 = vector.load %arg3[%c0_14, %c0_15] : memref<8x128xf32, #tpu.memory_space<vmem>>, vector<8x128xf32>
    tpu.vector_store %arg3[%c0_14, %c0_15], %40 {strides = array<i32>} : memref<8x128xf32, #tpu.memory_space<vmem>>, vector<8x128xf32>,
    return
  }
  func.func @transform_0(%arg0: i32) -> (i32, i32) {
    %c0_i32 = arith.constant 0 : i32
    %c0_i32_0 = arith.constant 0 : i32
    return %arg0, %c0_i32 : i32, i32
  }
  func.func @transform_1(%arg0: i32) -> (i32, i32) {
    %c0_i32 = arith.constant 0 : i32
    %c0_i32_0 = arith.constant 0 : i32
    %c0_i32_1 = arith.constant 0 : i32
    return %c0_i32, %c0_i32_0 : i32, i32
  }
  func.func @transform_2(%arg0: i32) -> (i32, i32) {
    %c0_i32 = arith.constant 0 : i32
    %c0_i32_0 = arith.constant 0 : i32
    return %arg0, %c0_i32 : i32, i32
  }
}

</mosaic_0001>

<bundles_post_ra>
// kernel: tpu_custom_call.1
= control target key start
LH: loop header
LB: loop body
LE: loop exit
PB: predicated region body
PF: predicated region fallthrough
CT: control target
= control target key end

     0   :  { %7 = vsyncpa [#allocation3], 0  ;;  %s858_s0 = inlined_call_operand.hbm [shape: f32[16,128], index: 0, kind: input, shape index: {}]   ;;  %s859_s1 = inlined_call_operand.hbm [shape: bf16[128,128], index: 1, kind: input, shape index: {}]   ;;  %s860_s2 = inlined_call_operand.hbm [shape: f32[16,128], index: 2, kind: output, shape index: {}]  }
   0x1   :  { %9 = vsyncpa [#allocation3 + $0x1], 0 }
   0x2   :  { %10 = vsyncpa [#allocation6], 0 }
   0x3   :  { %11 = vsyncpa [#allocation4], 0 }
   0x4   :  { %13 = vsyncpa [#allocation4 + $0x1], 0  ;;  %s713_s9 = smov 0   ;;  %s715_s10 = smov 0  }
   0x5   :  { %s717_s11 = smov 0   ;;  %s719_s12 = smov 0  }
   0x6 LB: > { %s108_s15 = sshll.u32 %s859_s1, 4  ;;  %s737_s16 = sadd.s32 4294967295, %s693_s12   ;;  %s693_s12 = sphi %s719_s12, %s870_s12   ;;  %s689_s11 = sphi %s717_s11, %s869_s11   ;;  %s685_s10 = sphi %s715_s10, %s868_s10   ;;  %s681_s9 = sphi %s713_s9, %s867_s9   ;;  %s109_s15 = int_to_ptr.hbm [resolvable:$true] %s108_s15 }
   0x7   : > { %p443_p0 = scmp.ge.s32.totalorder %s693_s12, 1  ;;  %p40_p1 = scmp.eq.s32.totalorder %s737_s16, 0 }
   0x8   : > { %p97_p2 = scmp.lt.s32.totalorder %s693_s12, 3  ;;  %s695_s18 = smov [#allocation5]  }
   0x9   : > { %s110_s19 = sshll.u32 %s695_s18, 4  ;;  %s696_s20 = smov 64   ;;  %s111_s19 = int_to_ptr.vmem [resolvable:$true] %s110_s19 }
   0xa   : > { %p742_p3 = pnand %p443_p0, %p97_p2  ;;  %s697_s21 = smov 4  }
   0xb   : > { %s442_s22 = sadd.s32 4294967294, %s693_s12   ;;  %s753_s23 = sadd.s32 1, %s693_s12  }
   0xc   : > { %p504_p4 = pneg %p742_p3  ;;  %s26_s24 = sadd.s32 1, %s689_s11 }
   0xd   : > { %s23_s25 = ssub.s32 %s693_s12, %s753_s23  ;;  %p33_p7 = scmp.ne.s32.totalorder %s689_s11, %s685_s10 }
   0xe   : > { %p505_p6 = pnand %p504_p4, %p40_p1  ;;  %p24_p8 = scmp.eq.s32.totalorder %s23_s25, 0 }
   0xf   : > { %p34_p9 = scmp.eq.s32.totalorder %s693_s12, 0  ;;  %p39_p10 = scmp.ne.s32.totalorder %s685_s10, %s681_s9 }
  0x10   : > { %507 = dma.hbm_to_vmem [thread:$0]  (!%p505_p6), %s109_s15, 1024, %s111_s19, [#allocation6], %s696_s20, %s696_s20, %s697_s21  }
  0x11   : > { %p84_p11 = scmp.eq.s32.totalorder %s737_s16, 1  ;;  %p769_p12 = por %p40_p1, %p39_p10 }
  0x12   : > { %s765_s26 = scalar_select %p24_p8, %s689_s11, %s26_s24  }
  0x13   : > { %p773_p13 = por %p84_p11, %p33_p7  ;;  %p90_p0 = scmp.eq.s32.totalorder %s442_s22, 1 }
  0x14   : > { %p35_p2 = por %p34_p9, %p33_p7  ;;  %s124_s29 = sand.u32 1, %s689_s11  }
  0x15   : > { %p778_p4 = por %p90_p0, %p39_p10  ;;  %p517_p6 = scmp.lt.s32.totalorder %s693_s12, 2 }
  0x16   : > { %s446_s3 = sshll.u32 %s124_s29, 3  ;;  %s447_s4 = sshll.u32 %s693_s12, 3 }
  0x17   : > { %s132_s7 = scalar_lea.hbm %s858_s0, %s447_s4  ;;  %s128_s13 = scalar_lea.vmem [#allocation2], %s446_s3 }
  0x18   : > { %s134_s8 = sshll.u32 %s132_s7, 4  ;;  %s136_s14 = sshll.u32 %s128_s13, 4  ;;  %s135_s8 = int_to_ptr.hbm [resolvable:$true] %s134_s8  ;;  %s137_s14 = int_to_ptr.vmem [resolvable:$true] %s136_s14 }
  0x19   : > { %p787_p8 = pnand %p517_p6, %p35_p2  ;;  %s125_s18 = scalar_lea.sflag [#allocation3], %s124_s29 }
  0x1a   : > { %s593_s19 = sshra.s32 %s135_s8, 4  ;;  %s600_s24 = scalar_lea.hbm %s858_s0, 16  ;;  %s594_s19 = int_to_ptr.hbm [resolvable:$true] %s593_s19 }
  0x1b   : > { %s595_s20 = scalar_lea.hbm %s594_s19, 8  ;;  %p597_p9 = pneg %p787_p8 }
  0x1c   : > { %p596_p7 = scmp.ne.s32.totalorder %s594_s19, %s595_s20  ;;  %p601_p0 = scmp.lt.s32.totalorder %s594_s19, %s858_s0 }
  0x1d   : > { %p602_p2 = scmp.lt.s32.totalorder %s600_s24, %s595_s20 }
  0x1e   : > { %p598_p10 = pnand %p597_p9, %p596_p7 }
  0x1f   : > { %p603_p6 = por %p602_p2, %p601_p0 }
  0x20   : > { %p599_p11 = pneg %p598_p10 }
  0x22   : > { %p604_p5 = pnand %p603_p6, %p599_p11 }
  0x24   : > { %607 = shalt.err (!%p604_p5)
}
  0x25   : > { %511 = dma.hbm_to_vmem [thread:$0]  (!%p787_p8), %s135_s8, 128, %s137_s14, %s125_s18  }
  0x26   : > { %145 = sbr.rel (%p742_p3) target bundleno = 289 (0x121), region = 28  ;;  %s804_s29 = sand.u32 (!%p742_p3), 1, %s685_s10  }
  0x27   : > { %s449_s4 = sshll.u32 (!%p742_p3), %s804_s29, 3  ;;  %s148_s5 = scalar_lea.sflag (!%p742_p3), [#allocation3], %s804_s29 }
  0x28   : > { %s151_s6 = scalar_lea.vmem (!%p742_p3), [#allocation2], %s449_s4 }
  0x2b   : > { %668 = dma.done.wait (%p769_p12), %s148_s5, 128  }
  0x2c   : > { %670 = vsyncadd (%p769_p12), %s148_s5, 4294967168 }
  0x2d   : > { %672 = dma.done.wait (%p40_p1), [#allocation6], 1024  }
  0x2e   : > { %674 = vsyncadd (%p40_p1), [#allocation6], 4294966272  ;;  %v495_v0 = vld [vmem:[#allocation5 + $0x38] sm:$0xff]  ;;  %v494_v1 = vld [vmem:[#allocation5 + $0x30] sm:$0xff]  ;;  %s485_s17 = sshll.u32 %s737_s16, 3  ;;  %s177_s13 = scalar_lea.vmem [#allocation7], %s449_s4 }
  0x2f   : > { %251 = vmatpush.bf16.msra.mxu0 %v495_v0  ;;  %264 = vmatpush.bf16.msra.mxu1 %v495_v0  ;;  %v818_v2 = vld [vmem:[%s151_s6] sm:$0xff]  ;;  %v493_v4 = vld [vmem:[#allocation5 + $0x28] sm:$0xff]  ;;  %v492_v6 = vld [vmem:[#allocation5 + $0x20] sm:$0xff]  ;;  %s357_s8 = scalar_lea.hbm %s860_s2, %s485_s17  ;;  %s359_s14 = sshll.u32 %s177_s13, 4  ;;  %s360_s14 = int_to_ptr.vmem [resolvable:$true] %s359_s14 }
  0x30   : > { %277 = vmatpush.bf16.msra.mxu2 %v495_v0  ;;  %v179_v3 = vmul.f32 %v818_v2, %v818_v2  ;;  %v491_v8 = vld [vmem:[#allocation5 + $0x18] sm:$0xff]  ;;  %v490_v10 = vld [vmem:[#allocation5 + $0x10] sm:$0xff]  ;;  %v489_v12 = vld [vmem:[#allocation5 + $0x8] sm:$0xff]  ;;  %s361_s15 = sshll.u32 %s357_s8, 4  ;;  %s347_s16 = scalar_lea.sflag [#allocation4], %s804_s29  ;;  %s362_s15 = int_to_ptr.hbm [resolvable:$true] %s361_s15 }
  0x31   : > { %v488_v14 = vld [vmem:[#allocation5] sm:$0xff]  ;;  %s637_s18 = sshra.s32 %s362_s15, 4  ;;  %s643_s22 = scalar_lea.hbm %s860_s2, 16  ;;  %s638_s18 = int_to_ptr.hbm [resolvable:$true] %s637_s18 }
  0x32   : > { %v180_v5 = vpack.c.bf16 %v179_v3, %v179_v3  ;;  %s639_s19 = scalar_lea.hbm %s638_s18, 8  ;;  %p644_p12 = scmp.lt.s32.totalorder %s638_s18, %s860_s2 }
  0x33   : > { %252 = vmatpush.bf16.msra.mxu0 %v494_v1  ;;  %265 = vmatpush.bf16.msra.mxu1 %v494_v1  ;;  %p640_p1 = scmp.ne.s32.totalorder %s638_s18, %s639_s19  ;;  %p645_p8 = scmp.lt.s32.totalorder %s643_s22, %s639_s19 }
  0x34   : > { %278 = vmatpush.bf16.msra.mxu2 %v494_v1  ;;  %v181_v7 = vunpack.c.l.bf16 %v180_v5 }
  0x35   : > { %p641_p3 = pnand %p640_p1, %p773_p13  ;;  %p646_p7 = por %p645_p8, %p644_p12 }
  0x36   : > { %v182_v9 = vsub.f32 %v179_v3, %v181_v7 }
  0x37   : > { %253 = vmatpush.bf16.msra.mxu0 %v493_v4  ;;  %266 = vmatpush.bf16.msra.mxu1 %v493_v4  ;;  %p642_p5 = pneg %p641_p3 }
  0x38   : > { %279 = vmatpush.bf16.msra.mxu2 %v493_v4  ;;  %v183_v11 = vpack.c.bf16 %v182_v9, %v182_v9 }
  0x39   : > { %p647_p9 = pnand %p646_p7, %p642_p5 }
  0x3a   : > { %v184_v13 = vunpack.c.l.bf16 %v183_v11 }
  0x3b   : > { %254 = vmatpush.bf16.msra.mxu0 %v492_v6  ;;  %267 = vmatpush.bf16.msra.mxu1 %v492_v6 }
  0x3c   : > { %280 = vmatpush.bf16.msra.mxu2 %v492_v6  ;;  %v185_v15 = vsub.f32 %v182_v9, %v184_v13 }
  0x3e   : > { %v186_v16 = vpack.c.bf16 %v185_v15, %v185_v15 }
  0x3f   : > { %255 = vmatpush.bf16.msra.mxu0 %v491_v8  ;;  %268 = vmatpush.bf16.msra.mxu1 %v491_v8 }
  0x40   : > { %281 = vmatpush.bf16.msra.mxu2 %v491_v8 }
  0x43   : > { %256 = vmatpush.bf16.msra.mxu0 %v490_v10  ;;  %269 = vmatpush.bf16.msra.mxu1 %v490_v10 }
  0x44   : > { %282 = vmatpush.bf16.msra.mxu2 %v490_v10 }
  0x47   : > { %257 = vmatpush.bf16.msra.mxu0 %v489_v12  ;;  %270 = vmatpush.bf16.msra.mxu1 %v489_v12 }
  0x48   : > { %283 = vmatpush.bf16.msra.mxu2 %v489_v12 }
  0x4b   : > { %258 = vmatpush.bf16.msra.mxu0 %v488_v14  ;;  %271 = vmatpush.bf16.msra.mxu1 %v488_v14 }
  0x4c   : > { %284 = vmatpush.bf16.msra.mxu2 %v488_v14 }
  0x4e   : > { %259 = vmatmul.bf16.vlgmr.msra.gmra.mxu0 %v183_v11  ;;  %272 = vmatmul.bf16.vlgmr.msra.gmra.mxu1 %v180_v5 }
  0x4f   : > { %285 = vmatmul.bf16.vlgmr.msra.gmra.mxu2 %v186_v16 }
  0xcb   : > { %v260_v17 = vpop.f32.mrf.mxu0  ;;  %v273_v18 = vpop.f32.mrf.mxu1 }
  0xcc   : > { %v274_v19 = vadd.f32 %v273_v18, %v260_v17 }
  0xd2   : > { %v286_v20 = vpop.f32.mrf.mxu2 }
  0xd3   : > { %v290_v21 = vadd.f32 %v286_v20, %v274_v19  ;;  %v262_v22 = vpop.f32.mrf.mxu0  ;;  %v275_v23 = vpop.f32.mrf.mxu1 }
  0xd5   : > { %555 = vrsqrt.f32 %v290_v21  ;;  %vm298_vm0 = vcmp.eq.f32.partialorder %v290_v21, inf  ;;  %v301_v32 = vand.u32 2147483648, %v290_v21  ;;  %vm300_vm1 = vcmp.eq.f32.partialorder %v290_v21, 0.0 }
  0xda   : > { %v288_v24 = vpop.f32.mrf.mxu2 }
  0xdb   : > { %v556_v25 = vpop.eup %555 }
  0xdc   : > { %v292_v26 = vmul.f32 %v556_v25, %v290_v21 }
  0xde   : > { %v293_v27 = vmul.f32 %v556_v25, %v292_v26 }
  0xe0   : > { %v294_v28 = vmul.f32 0.5, %v293_v27 }
  0xe2   : > { %v295_v29 = vsub.f32 1.5, %v294_v28 }
  0xe4   : > { %v296_v30 = vmul.f32 %v556_v25, %v295_v29 }
  0xe6   : > { %v297_v31 = vmul.f32 %v296_v30, %v290_v21 }
  0xe8   : > { %v299_v33 = vsel %vm298_vm0, %v290_v21, %v297_v31 }
  0xe9   : > { %v302_v34 = vsel %vm300_vm1, %v301_v32, %v299_v33 }
  0xea   : > { %v303_v35 = vadd.f32 1e-05, %v302_v34 }
  0xec   : > { %557 = vrcp.f32 %v303_v35  ;;  %v315_v39 = vand.u32 2147483648, %v303_v35  ;;  %v313_v41 = vand.u32 2147483647, %v303_v35  ;;  %vm309_vm3 = vweird.f32 %v303_v35 }
  0xee   : > { %v316_v43 = vor.u32 1.1754944e-38, %v315_v39  ;;  %vm314_vm5 = vcmp.eq.f32.partialorder %v313_v41, 8.507059e+37 }
  0xf2   : > { %v558_v36 = vpop.eup %557 }
  0xf3   : > { %v305_v37 = vmul.f32 %v558_v36, %v303_v35  ;;  %vm310_vm2 = vweird.f32 %v558_v36 }
  0xf4   : > { %vm311_vm4 = vmor %vm309_vm3, %vm310_vm2 }
  0xf5   : > { %v306_v38 = vsub.f32 1.0, %v305_v37 }
  0xf7   : > { %v307_v40 = vmul.f32 %v558_v36, %v306_v38 }
  0xf9   : > { %v308_v42 = vadd.f32 %v558_v36, %v307_v40 }
  0xfb   : > { %v312_v44 = vsel %vm311_vm4, %v558_v36, %v308_v42 }
  0xfc   : > { %v317_v45 = vsel %vm314_vm5, %v316_v43, %v312_v44 }
  0xfd   : > { %v319_v46 = vmin.f32 %v317_v45, 1.0 }
  0xff   : > { %v320_v47 = vmul.f32 %v319_v46, %v302_v34 }
 0x101   : > { %v321_v48 = vmax.f32 %v320_v47, 1e-05 }
 0x103   : > { %559 = vrcp.f32 %v321_v48  ;;  %v333_v52 = vand.u32 2147483648, %v321_v48  ;;  %v331_v54 = vand.u32 2147483647, %v321_v48  ;;  %vm327_vm7 = vweird.f32 %v321_v48 }
 0x104   : > { %561 = vtanh.f32 %v321_v48 }
 0x105   : > { %v334_v56 = vor.u32 1.1754944e-38, %v333_v52  ;;  %vm332_vm9 = vcmp.eq.f32.partialorder %v331_v54, 8.507059e+37 }
 0x109   : > { %v560_v49 = vpop.eup %559 }
 0x10a   : > { %v323_v50 = vmul.f32 %v560_v49, %v321_v48  ;;  %vm328_vm6 = vweird.f32 %v560_v49  ;;  %v562_v58 = vpop.eup %561 }
 0x10b   : > { %vm329_vm8 = vmor %vm327_vm7, %vm328_vm6 }
 0x10c   : > { %v324_v51 = vsub.f32 1.0, %v323_v50 }
 0x10e   : > { %v325_v53 = vmul.f32 %v560_v49, %v324_v51 }
 0x110   : > { %v326_v55 = vadd.f32 %v560_v49, %v325_v53 }
 0x112   : > { %v330_v57 = vsel %vm329_vm8, %v560_v49, %v326_v55 }
 0x113   : > { %v335_v59 = vsel %vm332_vm9, %v334_v56, %v330_v57 }
 0x114   : > { %v338_v60 = vmul.f32 %v562_v58, %v335_v59  ;;  %v341_v62 = vmul.f32 0.999, %v335_v59 }
 0x116   : > { %v339_v61 = vmul.f32 %v338_v60, %v320_v47 }
 0x118   : > { %vm340_vm10 = vcmp.gt.f32.partialorder %v339_v61, 0.999 }
 0x119   : > { %v342_v63 = vsel %vm340_vm10, %v341_v62, %v338_v60 }
 0x11a   : > { %v343_v0 = vmul.f32 %v342_v63, %v319_v46 }
 0x11c   : > { %v344_v1 = vmul.f32 %v343_v0, %v818_v2 }
 0x11e   : > { %345 = vst [vmem:[%s177_s13] sm:$0xff] %v344_v1 }
 0x11f   : > { %650 = shalt.err (!%p647_p9)
}
 0x120   : > { %502 = dma.vmem_to_hbm [thread:$0]  (%p773_p13), %s360_s14, 128, %s362_s15, %s347_s16  }
 0x121 PF: > { %s373_s3 = sand.u32 1, %s681_s9   ;;  %p866_p10 = scmp.ge.s32.totalorder %s693_s12, 2 }
 0x122   : > { %s374_s29 = scalar_lea.sflag [#allocation4], %s373_s3 }
 0x123   : > { %p513_p11 = pnand %p866_p10, %p778_p4 }
 0x125   : > { %p514_p0 = pneg %p513_p11 }
 0x127   : > { %676 = dma.done.wait (%p514_p0), %s374_s29, 128  }
 0x128   : > { %678 = vsyncadd (%p514_p0), %s374_s29, 4294967168  ;;  %p16_p2 = scmp.ge.s32.totalorder %s753_s23, 4   ;;  %s867_s9 = smov %s685_s10 }
 0x129   : > { %s868_s10 = smov %s689_s11  ;;  %s869_s11 = smov %s765_s26 }
 0x12a   : > { %s870_s12 = smov %s753_s23  ;;  %18 = sbr.rel (!%p16_p2) target bundleno = 6 (0x6), region = 77 }
 0x12f   :  { %380 = vsyncpa [#allocation3], 1 }
 0x130   :  { %382 = vsyncpa [#allocation3 + $0x1], 1 }
 0x131   :  { %383 = vsyncpa [#allocation6], 1 }
 0x132   :  { %384 = vsyncpa [#allocation4], 1 }
 0x133   :  { %386 = vsyncpa [#allocation4 + $0x1], 1 }

</bundles_post_ra>
